<compile_context>
chip_gen: v6e
topology: v6e:2x2x1
jax: 0.10.0
libtpu: 0.0.40
codegen_flags: <defaults>
</compile_context>

<pallas_src>
import functools

import jax
import jax.numpy as jnp
from jax.experimental import pallas as pl
from jax.experimental.pallas import tpu as pltpu

LANES = 128
SUBLANES = 8
N_SPLITS = 2  # outer "parallel" grid axis (uses both TensorCores on v7x)


def _bce_kernel(x_ref, y_ref, out_ref, *, n_valid, tile_rows, tiles_per_core):
    """One grid step processes a (tile_rows, 128) slab of logits/labels.

    Stable BCE-with-logits per element:
        l(x, y) = max(x, 0) - x*y + log(1 + exp(-|x|))
    Partial sums accumulate into the per-core (8, 128) output block (its index
    map is constant along the inner reduction axis, so it stays VMEM-resident).
    """
    c = pl.program_id(0)  # core split (parallel)
    i = pl.program_id(1)  # reduction step (arbitrary)

    @pl.when(i == 0)
    def _():
        out_ref[...] = jnp.zeros_like(out_ref)

    # Cast inside the kernel: callers may keep bf16/int inputs in HBM.
    x = x_ref[...].astype(jnp.float32)
    y = y_ref[...].astype(jnp.float32)

    loss = jnp.maximum(x, 0.0) - x * y + jnp.log1p(jnp.exp(-jnp.abs(x)))

    tile_elems = tile_rows * LANES
    tile_start = (c * tiles_per_core + i) * tile_elems

    # Fast path: tile is entirely valid -> no mask work at all.
    @pl.when(tile_start + tile_elems <= n_valid)
    def _():
        out_ref[...] += loss.reshape(-1, SUBLANES, LANES).sum(axis=0)

    # Slow path: only tiles overlapping padding / phantom (clamped) tiles.
    @pl.when(tile_start + tile_elems > n_valid)
    def _():
        row = jax.lax.broadcasted_iota(jnp.int32, (tile_rows, LANES), 0)
        col = jax.lax.broadcasted_iota(jnp.int32, (tile_rows, LANES), 1)
        flat_idx = tile_start + row * LANES + col
        masked = jnp.where(flat_idx < n_valid, loss, 0.0)
        out_ref[...] += masked.reshape(-1, SUBLANES, LANES).sum(axis=0)


def bce_with_logits_loss(outputs, labels, *, tile_rows=1024):
    """Mean BCE-with-logits over all elements (== torch BCEWithLogitsLoss())."""
    assert outputs.shape == labels.shape
    n = int(outputs.size)
    assert n > 0

    x = jnp.ravel(outputs)
    y = jnp.ravel(labels)

    rows = pl.cdiv(n, LANES)
    if n % LANES != 0:
        # TODO(synk): ragged-lane tail -> minimal zero-pad copy (masked in-kernel).
        pad = rows * LANES - n
        x = jnp.pad(x, (0, pad))
        y = jnp.pad(y, (0, pad))

    x2 = x.reshape(rows, LANES)
    y2 = y.reshape(rows, LANES)

    # Clamp tile to the data size, keep it a multiple of 8 sublanes.
    tile_rows = min(tile_rows, SUBLANES * pl.cdiv(rows, SUBLANES))
    tile_rows = max(SUBLANES, (tile_rows // SUBLANES) * SUBLANES)

    n_tiles = pl.cdiv(rows, tile_rows)
    tiles_per_core = pl.cdiv(n_tiles, N_SPLITS)

    def in_map(c, i):
        # Clamp phantom tiles (odd n_tiles) onto a valid block; the kernel's
        # flat-index mask zeroes their contribution.
        return (jnp.minimum(c * tiles_per_core + i, n_tiles - 1), 0)

    kernel = functools.partial(
        _bce_kernel, n_valid=n, tile_rows=tile_rows, tiles_per_core=tiles_per_core
    )

    partials = pl.pallas_call(
        kernel,
        out_shape=jax.ShapeDtypeStruct((N_SPLITS, SUBLANES, LANES), jnp.float32),
        grid_spec=pltpu.PrefetchScalarGridSpec(
            num_scalar_prefetch=0,
            grid=(N_SPLITS, tiles_per_core),
            in_specs=[
                pl.BlockSpec((tile_rows, LANES), in_map),
                pl.BlockSpec((tile_rows, LANES), in_map),
            ],
            out_specs=pl.BlockSpec((None, SUBLANES, LANES), lambda c, i: (c, 0, 0)),
        ),
        compiler_params=pltpu.CompilerParams(
            dimension_semantics=("parallel", "arbitrary"),
        ),
    )(x2, y2)

    # Tiny final cross-lane reduce + mean in the wrapper.
    return jnp.sum(partials) / jnp.float32(n)


class Criterion:
    """JAX/Pallas port of psam Criterion (default: BCEWithLogitsLoss, mean)."""

    def __init__(self, pos_weight=None, onehot=False, weights=None):
        if onehot:
            # TODO(synk): CrossEntropyLoss branch not ported.
            raise NotImplementedError("onehot=True (CrossEntropyLoss) not implemented")
        if pos_weight is not None:
            # TODO(synk): pos_weight scaling not ported (default is None).
            raise NotImplementedError("pos_weight not implemented")

    def __call__(self, outputs, lbls):
        return bce_with_logits_loss(outputs, lbls)


if __name__ == "__main__":
    key = jax.random.PRNGKey(0)
    k1, k2, k3, k4 = jax.random.split(key, 4)

    def ref_loss(x, y):
        x = x.astype(jnp.float32)
        y = y.astype(jnp.float32)
        return jnp.mean(jnp.maximum(x, 0.0) - x * y + jnp.log1p(jnp.exp(-jnp.abs(x))))

    criterion = Criterion()

    # NCHW logits and binary labels, small lane-aligned shape (2*4*16*16 = 2048).
    outputs = jax.random.normal(k1, (2, 4, 16, 16), dtype=jnp.float32)
    lbls = (jax.random.uniform(k2, (2, 4, 16, 16)) > 0.5).astype(jnp.float32)
    loss = jax.block_until_ready(criterion(outputs, lbls))
    assert jnp.allclose(loss, ref_loss(outputs, lbls), rtol=1e-5, atol=1e-6), (
        loss, ref_loss(outputs, lbls))

    # Ragged / multi-tile path: element count not a multiple of 128, small
    # tile_rows so the reduction loop, two-core split, and mask branch run.
    outputs2 = jax.random.normal(k3, (3, 5, 7, 11), dtype=jnp.float32)
    lbls2 = (jax.random.uniform(k4, (3, 5, 7, 11)) > 0.5).astype(jnp.float32)
    loss2 = jax.block_until_ready(bce_with_logits_loss(outputs2, lbls2, tile_rows=8))
    assert jnp.allclose(loss2, ref_loss(outputs2, lbls2), rtol=1e-5, atol=1e-6), (
        loss2, ref_loss(outputs2, lbls2))

    print("KERNEL_OK")
</pallas_src>

<mosaic_0001>
module attributes {stable_mosaic.version = 11 : i64} {
  func.func @_bce_kernel(%arg0: i32, %arg1: i32, %arg2: memref<16x128xf32, #tpu.memory_space<vmem>>, %arg3: memref<16x128xf32, #tpu.memory_space<vmem>>, %arg4: memref<1x8x128xf32, #tpu.memory_space<vmem>>) attributes {dimension_semantics = [#tpu.dimension_semantics<parallel>, #tpu.dimension_semantics<arbitrary>], iteration_bounds = array<i64: 2, 1>, scalar_prefetch = 0 : i64, scratch_operands = 0 : i64, tpu.core_type = #tpu.core_type<tc>, window_params = [{transform_indices = @transform_0, window_bounds = array<i64: 16, 128>}, {transform_indices = @transform_1, window_bounds = array<i64: 16, 128>}, {transform_indices = @transform_2, window_bounds = array<i64: 1, 8, 128>}]} {
    %c0_i32 = arith.constant 0 : i32
    %0 = arith.cmpi eq, %arg1, %c0_i32 : i32
    %1 = arith.extui %0 : i1 to i32
    %c0_i32_0 = arith.constant 0 : i32
    %2 = arith.cmpi ne, %1, %c0_i32_0 : i32
    scf.if %2 {
      %cst_11 = arith.constant 0.000000e+00 : f32
      %26 = vector.broadcast %cst_11 : f32 to vector<8x128xf32>
      %c0_12 = arith.constant 0 : index
      %c0_13 = arith.constant 0 : index
      %c0_14 = arith.constant 0 : index
      %27 = vector.load %arg4[%c0_12, %c0_13, %c0_14] : memref<1x8x128xf32, #tpu.memory_space<vmem>>, vector<1x8x128xf32>
      %28 = vector.shape_cast %27 : vector<1x8x128xf32> to vector<8x128xf32>
      %29 = vector.shape_cast %26 : vector<8x128xf32> to vector<1x8x128xf32>
      tpu.vector_store %arg4[%c0_12, %c0_13, %c0_14], %29 {strides = array<i32>} : memref<1x8x128xf32, #tpu.memory_space<vmem>>, vector<1x8x128xf32>,
    } else {
    }
    %c0 = arith.constant 0 : index
    %c0_1 = arith.constant 0 : index
    %3 = vector.load %arg2[%c0, %c0_1] : memref<16x128xf32, #tpu.memory_space<vmem>>, vector<16x128xf32>
    %c0_2 = arith.constant 0 : index
    %c0_3 = arith.constant 0 : index
    %4 = vector.load %arg3[%c0_2, %c0_3] : memref<16x128xf32, #tpu.memory_space<vmem>>, vector<16x128xf32>
    %cst = arith.constant 0.000000e+00 : f32
    %5 = vector.broadcast %cst : f32 to vector<16x128xf32>
    %6 = arith.maximumf %3, %5 : vector<16x128xf32>
    %7 = arith.mulf %3, %4 : vector<16x128xf32>
    %8 = arith.subf %6, %7 : vector<16x128xf32>
    %9 = math.absf %3 : vector<16x128xf32>
    %cst_4 = arith.constant 0.000000e+00 : f32
    %10 = vector.broadcast %cst_4 : f32 to vector<16x128xf32>
    %11 = arith.subf %10, %9 : vector<16x128xf32>
    %12 = math.exp %11 : vector<16x128xf32>
    %13 = math.log1p %12 : vector<16x128xf32>
    %14 = arith.addf %8, %13 : vector<16x128xf32>
    %c1_i32 = arith.constant 1 : i32
    %15 = arith.muli %arg0, %c1_i32 : i32
    %16 = arith.addi %15, %arg1 : i32
    %c2048_i32 = arith.constant 2048 : i32
    %17 = arith.muli %16, %c2048_i32 : i32
    %c2048_i32_5 = arith.constant 2048 : i32
    %18 = arith.addi %17, %c2048_i32_5 : i32
    %c2048_i32_6 = arith.constant 2048 : i32
    %19 = arith.cmpi sle, %18, %c2048_i32_6 : i32
    %20 = arith.extui %19 : i1 to i32
    %c0_i32_7 = arith.constant 0 : i32
    %21 = arith.cmpi ne, %20, %c0_i32_7 : i32
    scf.if %21 {
      %c0_11 = arith.constant 0 : index
      %c0_12 = arith.constant 0 : index
      %c0_13 = arith.constant 0 : index
      %26 = vector.load %arg4[%c0_11, %c0_12, %c0_13] : memref<1x8x128xf32, #tpu.memory_space<vmem>>, vector<1x8x128xf32>
      %27 = vector.shape_cast %26 : vector<1x8x128xf32> to vector<8x128xf32>
      %28 = vector.shape_cast %14 : vector<16x128xf32> to vector<2x8x128xf32>
      %cst_14 = arith.constant dense<0.000000e+00> : vector<8x128xf32>
      %29 = vector.multi_reduction <add>, %28, %cst_14 [0] : vector<2x8x128xf32> to vector<8x128xf32>
      %30 = arith.addf %27, %29 : vector<8x128xf32>
      %c0_15 = arith.constant 0 : index
      %c0_16 = arith.constant 0 : index
      %c0_17 = arith.constant 0 : index
      %31 = vector.load %arg4[%c0_15, %c0_16, %c0_17] : memref<1x8x128xf32, #tpu.memory_space<vmem>>, vector<1x8x128xf32>
      %32 = vector.shape_cast %31 : vector<1x8x128xf32> to vector<8x128xf32>
      %33 = vector.shape_cast %30 : vector<8x128xf32> to vector<1x8x128xf32>
      tpu.vector_store %arg4[%c0_15, %c0_16, %c0_17], %33 {strides = array<i32>} : memref<1x8x128xf32, #tpu.memory_space<vmem>>, vector<1x8x128xf32>,
    } else {
    }
    %c2048_i32_8 = arith.constant 2048 : i32
    %22 = arith.addi %17, %c2048_i32_8 : i32
    %c2048_i32_9 = arith.constant 2048 : i32
    %23 = arith.cmpi sgt, %22, %c2048_i32_9 : i32
    %24 = arith.extui %23 : i1 to i32
    %c0_i32_10 = arith.constant 0 : i32
    %25 = arith.cmpi ne, %24, %c0_i32_10 : i32
    scf.if %25 {
      %26 = tpu.iota {dimensions = array<i32: 0>} : vector<16x128xi32>
      %27 = tpu.iota {dimensions = array<i32: 1>} : vector<16x128xi32>
      %c128_i32 = arith.constant 128 : i32
      %28 = vector.broadcast %c128_i32 : i32 to vector<16x128xi32>
      %29 = arith.muli %26, %28 : vector<16x128xi32>
      %30 = vector.broadcast %17 : i32 to vector<16x128xi32>
      %31 = arith.addi %30, %29 : vector<16x128xi32>
      %32 = arith.addi %31, %27 : vector<16x128xi32>
      %c2048_i32_11 = arith.constant 2048 : i32
      %33 = vector.broadcast %c2048_i32_11 : i32 to vector<16x128xi32>
      %34 = arith.cmpi slt, %32, %33 : vector<16x128xi32>
      %cst_12 = arith.constant 0.000000e+00 : f32
      %35 = vector.broadcast %cst_12 : f32 to vector<16x128xf32>
      %36 = arith.select %34, %14, %35 : vector<16x128xi1>, vector<16x128xf32>
      %c0_13 = arith.constant 0 : index
      %c0_14 = arith.constant 0 : index
      %c0_15 = arith.constant 0 : index
      %37 = vector.load %arg4[%c0_13, %c0_14, %c0_15] : memref<1x8x128xf32, #tpu.memory_space<vmem>>, vector<1x8x128xf32>
      %38 = vector.shape_cast %37 : vector<1x8x128xf32> to vector<8x128xf32>
      %39 = vector.shape_cast %36 : vector<16x128xf32> to vector<2x8x128xf32>
      %cst_16 = arith.constant dense<0.000000e+00> : vector<8x128xf32>
      %40 = vector.multi_reduction <add>, %39, %cst_16 [0] : vector<2x8x128xf32> to vector<8x128xf32>
      %41 = arith.addf %38, %40 : vector<8x128xf32>
      %c0_17 = arith.constant 0 : index
      %c0_18 = arith.constant 0 : index
      %c0_19 = arith.constant 0 : index
      %42 = vector.load %arg4[%c0_17, %c0_18, %c0_19] : memref<1x8x128xf32, #tpu.memory_space<vmem>>, vector<1x8x128xf32>
      %43 = vector.shape_cast %42 : vector<1x8x128xf32> to vector<8x128xf32>
      %44 = vector.shape_cast %41 : vector<8x128xf32> to vector<1x8x128xf32>
      tpu.vector_store %arg4[%c0_17, %c0_18, %c0_19], %44 {strides = array<i32>} : memref<1x8x128xf32, #tpu.memory_space<vmem>>, vector<1x8x128xf32>,
    } else {
    }
    return
  }
  func.func @transform_0(%arg0: i32, %arg1: i32) -> (i32, i32) {
    %c1_i32 = arith.constant 1 : i32
    %0 = arith.muli %arg0, %c1_i32 : i32
    %1 = arith.addi %0, %arg1 : i32
    %c0_i32 = arith.constant 0 : i32
    %2 = arith.minsi %1, %c0_i32 : i32
    %c0_i32_0 = arith.constant 0 : i32
    %c0_i32_1 = arith.constant 0 : i32
    return %2, %c0_i32_0 : i32, i32
  }
  func.func @transform_1(%arg0: i32, %arg1: i32) -> (i32, i32) {
    %c1_i32 = arith.constant 1 : i32
    %0 = arith.muli %arg0, %c1_i32 : i32
    %1 = arith.addi %0, %arg1 : i32
    %c0_i32 = arith.constant 0 : i32
    %2 = arith.minsi %1, %c0_i32 : i32
    %c0_i32_0 = arith.constant 0 : i32
    %c0_i32_1 = arith.constant 0 : i32
    return %2, %c0_i32_0 : i32, i32
  }
  func.func @transform_2(%arg0: i32, %arg1: i32) -> (i32, i32, i32) {
    %c0_i32 = arith.constant 0 : i32
    %c0_i32_0 = arith.constant 0 : i32
    %c0_i32_1 = arith.constant 0 : i32
    return %arg0, %c0_i32, %c0_i32_0 : i32, i32, i32
  }
}

</mosaic_0001>

<bundles_post_ra>
// kernel: tpu_custom_call.1
= control target key start
LH: loop header
LB: loop body
LE: loop exit
PB: predicated region body
PF: predicated region fallthrough
CT: control target
= control target key end

     0   :  { %7 = vsyncpa [#allocation3], 0  ;;  %s941_s0 = inlined_call_operand.hbm [shape: f32[16,128], index: 0, kind: input, shape index: {}]   ;;  %s942_s1 = inlined_call_operand.hbm [shape: f32[16,128], index: 1, kind: input, shape index: {}]   ;;  %s943_s2 = inlined_call_operand.hbm [shape: f32[2,8,128], index: 2, kind: output, shape index: {}]  }
   0x1   :  { %9 = vsyncpa [#allocation3 + $0x1], 0 }
   0x2   :  { %10 = vsyncpa [#allocation6], 0 }
   0x3   :  { %12 = vsyncpa [#allocation6 + $0x1], 0 }
   0x4   :  { %13 = vsyncpa [#allocation4], 0 }
   0x5   :  { %15 = vsyncpa [#allocation4 + $0x1], 0  ;;  %s742_s9 = smov 0   ;;  %s744_s10 = smov 0  }
   0x6   :  { %s746_s11 = smov 0   ;;  %s748_s12 = smov 0  }
   0x7   :  { %s750_s13 = smov 0   ;;  %s752_s14 = smov 0  }
   0x8   :  { %s754_s15 = smov 0   ;;  %s756_s16 = smov 0  }
   0x9 LB: > { %s433_s17 = sadd.s32 4294967295, %s719_s16   ;;  %s434_s18 = sadd.s32 4294967294, %s719_s16   ;;  %s719_s16 = sphi %s756_s16, %s21_s16   ;;  %s715_s15 = sphi %s754_s15, %s962_s15   ;;  %s711_s14 = sphi %s752_s14, %s961_s14   ;;  %s707_s13 = sphi %s750_s13, %s931_s13   ;;  %s703_s12 = sphi %s748_s12, %s960_s12   ;;  %s699_s11 = sphi %s746_s11, %s959_s11   ;;  %s695_s10 = sphi %s744_s10, %s958_s10   ;;  %s691_s9 = sphi %s742_s9, %s957_s9  }
   0xa   : > { %s33_s19 = sadd.s32 1, %s715_s15  ;;  %p688_p1 = scmp.ne.s32.totalorder %s707_s13, 0 }
   0xb   : > { %p35_p0 = scmp.ge.s32.totalorder %s33_s19, 2  ;;  %p54_p2 = scmp.eq.s32.totalorder %s719_s16, 0 }
   0xc   : > { %p59_p3 = scmp.ne.s32.totalorder %s707_s13, %s703_s12  ;;  %p60_p5 = scmp.eq.s32.totalorder %s433_s17, 0 }
   0xd   : > { %s964_s19 = smov (%p35_p0, %s33_s19), 0  ;;  %p788_p4 = por %p688_p1, %p54_p2 }
   0xe   : > { %p792_p6 = por %p60_p5, %p59_p3  ;;  %s101_s22 = ssub.s32 %s715_s15, %s964_s19 }
   0xf   : > { %p102_p7 = scmp.eq.s32.totalorder %s101_s22, 0  ;;  %s104_s23 = sadd.s32 1, %s699_s11 }
  0x10   : > { %s947_s21 = scalar_select %p792_p6, 1, 0 }
  0x11   : > { %s800_s24 = scalar_select %p102_p7, %s699_s11, %s104_s23  }
  0x12   : > { %p114_p8 = scmp.ne.s32.totalorder %s699_s11, %s695_s10  ;;  %p115_p9 = scmp.eq.s32.totalorder %s433_s17, 1 }
  0x13   : > { %p120_p10 = scmp.ne.s32.totalorder %s695_s10, %s691_s9  ;;  %p121_p11 = scmp.eq.s32.totalorder %s434_s18, 1 }
  0x14   : > { %p806_p12 = por %p115_p9, %p114_p8  ;;  %p473_p1 = scmp.lt.s32.totalorder %s719_s16, 2 }
  0x15   : > { %p811_p0 = por %p121_p11, %p120_p10  ;;  %s721_s27 = smov [#allocation2]  }
  0x16   : > { %s948_s25 = scalar_select %p806_p12, 1, 0 }
  0x17   : > { %s949_s26 = scalar_select %p811_p0, 1, 0 }
  0x18   : > { %s155_s28 = sshll.u32 %s721_s27, 4  ;;  %p818_p2 = pnand %p473_p1, %p788_p4  ;;  %s156_s28 = int_to_ptr.vmem [resolvable:$true] %s155_s28 }
  0x19   : > { %s558_s4 = scalar_lea.hbm %s941_s0, 256 }
  0x1a   : > { %p559_p3 = scmp.ne.s32.totalorder %s941_s0, %s558_s4  ;;  %p560_p5 = pneg %p818_p2 }
  0x1b   : > { %p565_p8 = scmp.lt.s32.totalorder %s558_s4, %s558_s4 }
  0x1c   : > { %p561_p7 = pnand %p560_p5, %p559_p3 }
  0x1e   : > { %p562_p4 = pneg %p561_p7 }
  0x20   : > { %p567_p9 = pnand %p565_p8, %p562_p4 }
  0x22   : > { %570 = shalt.err (!%p567_p9)
}
  0x23   : > { %s571_s7 = scalar_lea.vmem %s156_s28, 256  ;;  %s578_s8 = scalar_lea.vmem %s156_s28, 512 }
  0x24   : > { %p572_p10 = scmp.ne.s32.totalorder %s156_s28, %s571_s7  ;;  %p579_p13 = scmp.lt.s32.totalorder %s156_s28, %s156_s28 }
  0x25   : > { %p580_p0 = scmp.lt.s32.totalorder %s578_s8, %s571_s7 }
  0x26   : > { %p574_p11 = pnand %p572_p10, %p560_p5 }
  0x27   : > { %p581_p12 = por %p580_p0, %p579_p13 }
  0x28   : > { %p575_p1 = pneg %p574_p11 }
  0x2a   : > { %p582_p6 = pnand %p581_p12, %p575_p1 }
  0x2c   : > { %585 = shalt.err (!%p582_p6)
}
  0x2d   : > { %s722_s12 = smov 128   ;;  %s723_s17 = smov 8  }
  0x2e   : > { %465 = dma.hbm_to_vmem [thread:$0]  (!%p818_p2), %s941_s0, 256, %s156_s28, [#allocation3], %s722_s12, %s722_s12, %s723_s17  }
  0x2f   : > { %p443_p3 = scmp.ge.s32.totalorder %s719_s16, 1  ;;  %p187_p7 = scmp.lt.s32.totalorder %s719_s16, 3 }
  0x30   : > { %s724_s23 = smov [#allocation5]   ;;  %s586_s4 = scalar_lea.hbm %s942_s1, 256 }
  0x31   : > { %p843_p4 = pnand %p443_p3, %p187_p7  ;;  %s179_s27 = sshll.u32 %s724_s23, 4  ;;  %s180_s27 = int_to_ptr.vmem [resolvable:$true] %s179_s27 }
  0x32   : > { %p587_p6 = scmp.ne.s32.totalorder %s942_s1, %s586_s4  ;;  %p593_p0 = scmp.lt.s32.totalorder %s586_s4, %s586_s4 }
  0x33   : > { %s951_s22 = scalar_select %p843_p4, 1, 0 }
  0x34   : > { %p589_p12 = pnand %p587_p6, %p560_p5 }
  0x36   : > { %p590_p13 = pneg %p589_p12 }
  0x38   : > { %p595_p8 = pnand %p593_p0, %p590_p13 }
  0x3a   : > { %598 = shalt.err (!%p595_p8)
}
  0x3b   : > { %s599_s28 = scalar_lea.vmem %s180_s27, 256  ;;  %s606_s7 = scalar_lea.vmem %s180_s27, 512 }
  0x3c   : > { %p600_p9 = scmp.ne.s32.totalorder %s180_s27, %s599_s28  ;;  %p607_p1 = scmp.lt.s32.totalorder %s180_s27, %s180_s27 }
  0x3d   : > { %p608_p3 = scmp.lt.s32.totalorder %s606_s7, %s599_s28 }
  0x3e   : > { %p602_p10 = pnand %p600_p9, %p560_p5 }
  0x3f   : > { %p609_p7 = por %p608_p3, %p607_p1 }
  0x40   : > { %p603_p11 = pneg %p602_p10 }
  0x42   : > { %p610_p4 = pnand %p609_p7, %p603_p11 }
  0x44   : > { %613 = shalt.err (!%p610_p4)
}
  0x45   : > { %468 = dma.hbm_to_vmem [thread:$0]  (!%p818_p2), %s942_s1, 256, %s180_s27, [#allocation6], %s722_s12, %s722_s12, %s723_s17  }
  0x46   : > { %p952_p6 = scmp.ne.s32.totalorder %s951_s22, 0 }
  0x47   : > { %s193_s20 = sand.u32 (!%p952_p6), 1, %s707_s13   ;;  %p953_p5 = scmp.ne.s32.totalorder (!%p952_p6), %s947_s21, 0 }
  0x48   : > { %191 = sbr.rel (%p952_p6) target bundleno = 178 (0xb2), region = 28  ;;  %s444_s23 = sshll.u32 (!%p952_p6), %s193_s20, 4 }
  0x49   : > { %s194_s30 = scalar_lea.sflag (!%p952_p6), [#allocation3], %s193_s20  ;;  %s197_s3 = scalar_lea.vmem (!%p952_p6), [#allocation2], %s444_s23 }
  0x4d   : > { %677 = dma.done.wait (%p953_p5), %s194_s30, 256  }
  0x4e   : > { %679 = vsyncadd (%p953_p5), %s194_s30, 4294967040  ;;  %s203_s29 = scalar_lea.sflag [#allocation6], %s193_s20  ;;  %s206_s4 = scalar_lea.vmem [#allocation5], %s444_s23 }
  0x4f   : > { %681 = dma.done.wait (%p953_p5), %s203_s29, 256  }
  0x50   : > { %683 = vsyncadd (%p953_p5), %s203_s29, 4294967040  ;;  %s229_s12 = sand.u32 1, %s695_s10   ;;  %s447_s17 = sshll.u32 %s711_s14, 11  ;;  %v725_v0 = vmov 0.0   ;;  %v245_v1 = vld [vmem:[%s197_s3] sm:$0xff]  ;;  %v246_v2 = vld [vmem:[%s197_s3 + $0x8] sm:$0xff] }
  0x51   : > { %s446_s22 = sshll.u32 %s229_s12, 3  ;;  %s881_s27 = sadd.s32 2048, %s447_s17  ;;  %v255_v3 = vand.u32 2147483647, %v245_v1  ;;  %v256_v4 = vand.u32 2147483647, %v246_v2 }
  0x52   : > { %s883_s5 = scalar_lea.vmem [#allocation7], %s446_s22  ;;  %v247_v15 = vld [vmem:[%s206_s4] sm:$0xff]  ;;  %v248_v16 = vld [vmem:[%s206_s4 + $0x8] sm:$0xff]  ;;  %v249_v18 = vmax.f32 %v245_v1, 0.0  ;;  %v250_v22 = vmax.f32 %v246_v2, 0.0  ;;  %p448_p2 = scmp.gt.s32.totalorder %s881_s27, 2048 }
  0x53   : > { %244 = vst [vmem:[%s883_s5] sm:$0xff] %v725_v0  ;;  %v257_v5 = vsub.f32 0.0, %v255_v3  ;;  %v258_v6 = vsub.f32 0.0, %v256_v4  ;;  %v251_v19 = vmul.f32 %v247_v15, %v245_v1  ;;  %v252_v23 = vmul.f32 %v248_v16, %v246_v2 }
  0x55   : > { %v259_v7 = vmul.f32 1.442695, %v257_v5  ;;  %v261_v8 = vmul.f32 1.442695, %v258_v6  ;;  %v253_v27 = vsub.f32 %v249_v18, %v251_v19  ;;  %v254_v30 = vsub.f32 %v250_v22, %v252_v23 }
  0x57   : > { %550 = vpow2.f32 %v259_v7 }
  0x58   : > { %552 = vpow2.f32 %v261_v8 }
  0x64   : > { %v551_v9 = vpop.eup %550 }
  0x65   : > { %v553_v10 = vpop.eup %552  ;;  %v263_v11 = vadd.f32 1.0, %v551_v9  ;;  %v266_v13 = vmul.f32 -0.5, %v551_v9  ;;  %v269_v20 = vand.u32 2147483647, %v551_v9 }
  0x66   : > { %v272_v12 = vadd.f32 1.0, %v553_v10  ;;  %v275_v14 = vmul.f32 -0.5, %v553_v10  ;;  %v278_v24 = vand.u32 2147483647, %v553_v10 }
  0x67   : > { %554 = vlog2.f32 %v263_v11  ;;  %v267_v17 = vadd.f32 1.0, %v266_v13  ;;  %vm270_vm0 = vcmp.lt.f32.partialorder %v269_v20, 0.0004427343 }
  0x68   : > { %556 = vlog2.f32 %v272_v12  ;;  %v276_v21 = vadd.f32 1.0, %v275_v14  ;;  %vm279_vm1 = vcmp.lt.f32.partialorder %v278_v24, 0.0004427343 }
  0x69   : > { %v268_v25 = vmul.f32 %v551_v9, %v267_v17 }
  0x6a   : > { %v277_v28 = vmul.f32 %v553_v10, %v276_v21 }
  0x74   : > { %v555_v26 = vpop.eup %554 }
  0x75   : > { %v557_v29 = vpop.eup %556  ;;  %v265_v31 = vmul.f32 0.6931472, %v555_v26  ;;  %289 = sbr.rel (%p448_p2) target bundleno = 128 (0x80), region = 44 }
  0x76   : > { %v274_v32 = vmul.f32 0.6931472, %v557_v29 }
  0x77   : > { %v271_v33 = vsel %vm270_vm0, %v268_v25, %v265_v31 }
  0x78   : > { %v280_v34 = vsel %vm279_vm1, %v277_v28, %v274_v32  ;;  %v281_v35 = vadd.f32 %v271_v33, %v253_v27 }
  0x79   : > { %v282_v36 = vadd.f32 %v280_v34, %v254_v30 }
  0x7a   : > { %v290_v37 = vld [vmem:[%s883_s5] sm:$0xff] }
  0x7b   : > { %v291_v38 = vadd.f32 %v282_v36, %v281_v35 }
  0x7d   : > { %v292_v39 = vadd.f32 %v291_v38, %v290_v37 }
  0x7f   : > { %293 = vst [vmem:[%s883_s5] sm:$0xff] %v292_v39 }
  0x80 PF: > { %p449_p4 = scmp.le.s32.totalorder %s881_s27, 2048 }
  0x82   : > { %297 = sbr.rel (%p449_p4) target bundleno = 154 (0x9a), region = 48 }
  0x87   : > { %v298_v40 = vlaneseq  ;;  %v305_v42 = vstv %s447_s17  ;;  %v314_v53 = vld [vmem:[%s883_s5] sm:$0xff] }
  0x89   : > { %v299_v41 = vshrl.u32 %v298_v40, 7  ;;  %v302_v44 = vand.u32 127, %v298_v40 }
  0x8b   : > { %v300_v43 = vadd.s32 8, %v299_v41  ;;  %v303_v45 = vmul.u32 128, %v299_v41 }
  0x8d   : > { %v304_v46 = vmul.u32 128, %v300_v43  ;;  %v306_v47 = vadd.s32 %v305_v42, %v303_v45 }
  0x8f   : > { %v307_v48 = vadd.s32 %v305_v42, %v304_v46  ;;  %v308_v49 = vadd.s32 %v306_v47, %v302_v44 }
  0x91   : > { %v309_v50 = vadd.s32 %v307_v48, %v302_v44  ;;  %vm310_vm2 = vcmp.lt.s32.totalorder %v308_v49, 2048 }
  0x92   : > { %v312_v51 = vsel %vm310_vm2, %v281_v35, 0.0 }
  0x93   : > { %vm311_vm3 = vcmp.lt.s32.totalorder %v309_v50, 2048 }
  0x94   : > { %v313_v52 = vsel %vm311_vm3, %v282_v36, 0.0 }
  0x95   : > { %v315_v54 = vadd.f32 %v313_v52, %v312_v51 }
  0x97   : > { %v316_v55 = vadd.f32 %v315_v54, %v314_v53 }
  0x99   : > { %317 = vst [vmem:[%s883_s5] sm:$0xff] %v316_v55 }
  0x9a PF: > { %s451_s21 = sshll.u32 %s711_s14, 7  ;;  %s332_s8 = sshll.u32 %s883_s5, 4  ;;  %s333_s8 = int_to_ptr.vmem [resolvable:$true] %s332_s8 }
  0x9b   : > { %s330_s7 = scalar_lea.hbm %s943_s2, %s451_s21  ;;  %s319_s18 = scalar_lea.sflag [#allocation4], %s229_s12 }
  0x9c   : > { %s614_s20 = scalar_lea.vmem %s333_s8, 128  ;;  %p954_p13 = scmp.ne.s32.totalorder %s948_s25, 0 }
  0x9d   : > { %p615_p12 = scmp.ne.s32.totalorder %s333_s8, %s614_s20  ;;  %s726_s23 = smov [#allocation7]  }
  0x9e   : > { %s618_s30 = sshll.u32 %s726_s23, 4  ;;  %s619_s30 = int_to_ptr.vmem [resolvable:$false] %s618_s30 }
  0x9f   : > { %p616_p0 = pnand %p615_p12, %p954_p13  ;;  %s620_s3 = scalar_lea.vmem %s619_s30, 256 }
  0xa0   : > { %p621_p9 = scmp.lt.s32.totalorder %s333_s8, %s619_s30  ;;  %p622_p10 = scmp.lt.s32.totalorder %s620_s3, %s614_s20 }
  0xa1   : > { %p617_p8 = pneg %p616_p0 }
  0xa2   : > { %p623_p11 = por %p622_p10, %p621_p9 }
  0xa4   : > { %p624_p1 = pnand %p623_p11, %p617_p8 }
  0xa6   : > { %627 = shalt.err (!%p624_p1)
}
  0xa7   : > { %s628_s14 = scalar_lea.hbm %s330_s7, 128  ;;  %s632_s12 = scalar_lea.hbm %s943_s2, 256 }
  0xa8   : > { %p629_p3 = scmp.ne.s32.totalorder %s330_s7, %s628_s14  ;;  %p633_p5 = scmp.lt.s32.totalorder %s330_s7, %s943_s2 }
  0xa9   : > { %p634_p2 = scmp.lt.s32.totalorder %s632_s12, %s628_s14 }
  0xaa   : > { %p630_p7 = pnand %p629_p3, %p954_p13 }
  0xab   : > { %p635_p4 = por %p634_p2, %p633_p5 }
  0xac   : > { %p631_p6 = pneg %p630_p7 }
  0xae   : > { %p636_p12 = pnand %p635_p4, %p631_p6 }
  0xb0   : > { %639 = shalt.err (!%p636_p12)
}
  0xb1   : > { %460 = dma.vmem_to_hbm [thread:$0]  (%p954_p13), %s333_s8, 128, %s330_s7, %s319_s18  }
  0xb2 PF: > { %s344_s27 = sand.u32 1, %s691_s9   ;;  %p955_p0 = scmp.ne.s32.totalorder %s949_s26, 0 }
  0xb3   : > { %p956_p8 = scmp.ge.s32.totalorder %s719_s16, 2  ;;  %s345_s5 = scalar_lea.sflag [#allocation4], %s344_s27 }
  0xb5   : > { %p470_p9 = pnand %p956_p8, %p955_p0 }
  0xb7   : > { %p471_p10 = pneg %p470_p9 }
  0xb9   : > { %685 = dma.done.wait (%p471_p10), %s345_s5, 128  }
  0xba   : > { %687 = vsyncadd (%p471_p10), %s345_s5, 4294967168  ;;  %s21_s16 = sadd.s32 1, %s719_s16   ;;  %s957_s9 = smov %s695_s10 }
  0xbb   : > { %p18_p11 = scmp.ge.s32.totalorder %s21_s16, 4   ;;  %s958_s10 = smov %s699_s11 }
  0xbc   : > { %s959_s11 = smov %s800_s24  ;;  %s960_s12 = smov %s707_s13 }
  0xbd   : > { %s931_s13 = smov 0   ;;  %s961_s14 = smov %s715_s15 }
  0xbe   : > { %s962_s15 = smov %s964_s19  ;;  %20 = sbr.rel (!%p18_p11) target bundleno = 9 (0x9), region = 98 }
  0xc3   :  { %350 = vsyncpa [#allocation3], 1 }
  0xc4   :  { %352 = vsyncpa [#allocation3 + $0x1], 1 }
  0xc5   :  { %353 = vsyncpa [#allocation6], 1 }
  0xc6   :  { %355 = vsyncpa [#allocation6 + $0x1], 1 }
  0xc7   :  { %356 = vsyncpa [#allocation4], 1 }
  0xc8   :  { %358 = vsyncpa [#allocation4 + $0x1], 1 }

</bundles_post_ra>
